<compile_context>
chip_gen: v6e
topology: v6e:2x2x1
jax: 0.10.0
libtpu: 0.0.40
codegen_flags: <defaults>
</compile_context>

<pallas_src>
import jax
import jax.numpy as jnp
from jax.experimental import pallas as pl
from jax.experimental.pallas import tpu as pltpu


def basic_block_kernel(x_ref, w1_ref, b1_ref, w2_ref, b2_ref, o_ref, xp, hp):
    """One grid step = B batch images, fully fused residual block.

    x_ref : (B, H, WC)    bf16 NHWC rows with (W, C) flattened into lanes
    w1/w2 : (3*WC, WC)    bf16 block-Toeplitz conv weights (BN scale folded in)
    b1/b2 : (1, WC)       f32  folded BN bias, tiled over W
    o_ref : (B, H, WC)    f32  output
    xp/hp : (B, H+2, WC)  f32  scratch rows with a zero +/-1 row halo per image
    """
    B, H, WC = o_ref.shape

    # Zero ONLY the halo rows ("SAME" padding along H).  Padding along W is
    # structural zeros inside the Toeplitz weights.  Zeroed every step so each
    # megacore's scratch is always initialized.
    zrow = jnp.zeros((B, 1, WC), jnp.float32)
    xp[:, 0:1, :] = zrow
    xp[:, H + 1:H + 2, :] = zrow
    hp[:, 0:1, :] = zrow
    hp[:, H + 1:H + 2, :] = zrow

    xp[:, 1:H + 1, :] = x_ref[...].astype(jnp.float32)

    def conv3x3(src, w_ref, b_ref):
        # Three accumulating MXU matmuls on shifted row slices (M = B*H rows);
        # avoids materializing a (B*H, 3*WC) im2col copy.
        acc = None
        for k in range(3):
            a = src[:, k:k + H, :].reshape(B * H, WC).astype(jnp.bfloat16)
            p = jnp.dot(a, w_ref[k * WC:(k + 1) * WC, :],
                        preferred_element_type=jnp.float32)
            acc = p if acc is None else acc + p
        return acc + b_ref[...]                       # (B*H, WC) f32

    # ---- conv1 + bn1 + relu (h never leaves VMEM) ---------------------------
    h = jnp.maximum(conv3x3(xp, w1_ref, b1_ref), 0.0)
    hp[:, 1:H + 1, :] = h.reshape(B, H, WC)

    # ---- conv2 + bn2 + residual add + relu ----------------------------------
    y = conv3x3(hp, w2_ref, b2_ref)
    resid = x_ref[...].astype(jnp.float32).reshape(B * H, WC)  # re-read, not held
    o_ref[...] = jnp.maximum(y + resid, 0.0).reshape(B, H, WC)


def _row_conv_matrix(w_hwio, width):
    """Fold a 3x3 stride-1 'SAME' conv along W into a dense matmul weight.

    Returns T of shape (3*W*Cin, W*Cout) such that for zero-halo'd rows
    xp[h] (flattened as index w*Cin + ci):
        out_row[h] = concat(xp[h], xp[h+1], xp[h+2]) @ T
    Out-of-range W taps are structural zeros in T.
    """
    kh_, kw_, cin, cout = w_hwio.shape
    wi = jnp.arange(width)[:, None]                   # input column
    wo = jnp.arange(width)[None, :]                   # output column
    kw = wi - wo + (kw_ // 2)                         # which tap links wi -> wo
    valid = (kw >= 0) & (kw < kw_)
    kw_c = jnp.clip(kw, 0, kw_ - 1)
    blocks = w_hwio[:, kw_c, :, :] * valid[None, :, :, None, None]
    # (kh, wi, wo, ci, co) -> (kh, wi, ci, wo, co) -> (3*W*Cin, W*Cout)
    return blocks.transpose(0, 1, 3, 2, 4).reshape(kh_ * width * cin, width * cout)


def prepare_params(params, width):
    """Build the folded kernel weights ONCE (cache the result across calls)."""
    w1, s1, b1, w2, s2, b2 = params
    wc = width * b1.shape[0]
    w1t = _row_conv_matrix(w1 * s1, width).astype(jnp.bfloat16)   # (3*WC, WC)
    w2t = _row_conv_matrix(w2 * s2, width).astype(jnp.bfloat16)
    b1t = jnp.tile(b1.astype(jnp.float32), width).reshape(1, wc)
    b2t = jnp.tile(b2.astype(jnp.float32), width).reshape(1, wc)
    return w1t, b1t, w2t, b2t


def _pick_images_per_step(n, h, target_rows=256):
    """Largest divisor b of n with b*h ~<= target_rows: enough matmul rows per
    step to fill the MXU while leaving multiple grid steps when n is large."""
    cap = max(1, -(-target_rows // h))                # ceil(target_rows / h)
    best = 1
    for b in range(1, n + 1):
        if n % b == 0 and b <= cap:
            best = b
    return best


@jax.jit
def basic_block_rows(x_rows_bf16, w1t, b1t, w2t, b2t):
    """Fused BasicBlock on lane-dense rows.

    x_rows_bf16 : (N, H, W*C) bf16   ->   (N, H, W*C) f32
    Keep activations in this layout end-to-end; `prepare_params` output should
    be built once and reused (no per-call weight construction on this path).
    """
    N, H, WC = x_rows_bf16.shape
    B = _pick_images_per_step(N, H)
    return pl.pallas_call(
        basic_block_kernel,
        out_shape=jax.ShapeDtypeStruct((N, H, WC), jnp.float32),
        grid=(N // B,),
        in_specs=[
            pl.BlockSpec((B, H, WC), lambda n: (n, 0, 0)),
            pl.BlockSpec((3 * WC, WC), lambda n: (0, 0)),
            pl.BlockSpec((1, WC), lambda n: (0, 0)),
            pl.BlockSpec((3 * WC, WC), lambda n: (0, 0)),
            pl.BlockSpec((1, WC), lambda n: (0, 0)),
        ],
        out_specs=pl.BlockSpec((B, H, WC), lambda n: (n, 0, 0)),
        scratch_shapes=[
            pltpu.VMEM((B, H + 2, WC), jnp.float32),
            pltpu.VMEM((B, H + 2, WC), jnp.float32),
        ],
        compiler_params=pltpu.CompilerParams(
            dimension_semantics=("parallel",)),
    )(x_rows_bf16, w1t, b1t, w2t, b2t)


def reference_forward(x_nchw, params, bf16_operands):
    """Pure-JAX reference (lax.conv).

    bf16_operands=True mimics the kernel's MXU operand precision (bf16 inputs,
    f32 accumulation/epilogue); False is the full-f32 semantic reference.
    """
    w1, s1, b1, w2, s2, b2 = params
    x = jnp.transpose(x_nchw, (0, 2, 3, 1)).astype(jnp.float32)
    w1f = w1 * s1
    w2f = w2 * s2
    if bf16_operands:
        x = x.astype(jnp.bfloat16).astype(jnp.float32)
        w1f = w1f.astype(jnp.bfloat16).astype(jnp.float32)
        w2f = w2f.astype(jnp.bfloat16).astype(jnp.float32)
    dn = ('NHWC', 'HWIO', 'NHWC')
    c1 = jax.lax.conv_general_dilated(
        x, w1f, (1, 1), 'SAME', dimension_numbers=dn,
        precision=jax.lax.Precision.HIGHEST)
    h = jnp.maximum(c1 + b1, 0.0)
    if bf16_operands:
        h = h.astype(jnp.bfloat16).astype(jnp.float32)
    c2 = jax.lax.conv_general_dilated(
        h, w2f, (1, 1), 'SAME', dimension_numbers=dn,
        precision=jax.lax.Precision.HIGHEST)
    out = jnp.maximum(c2 + b2 + x, 0.0)
    return jnp.transpose(out, (0, 3, 1, 2))


def make_params(key, planes):
    """Deterministic parameter init (conv weights HWIO, folded BN params)."""
    k1, k2 = jax.random.split(key, 2)
    w1 = jax.random.normal(k1, (3, 3, planes, planes), jnp.float32) * 0.1
    w2 = jax.random.normal(k2, (3, 3, planes, planes), jnp.float32) * 0.1
    c = jnp.arange(planes, dtype=jnp.float32)
    eps = 1e-5
    gamma1, beta1 = 1.0 + 0.10 * c, 0.05 * c
    mean1, var1 = 0.01 * c, 1.0 + 0.02 * c
    s1 = gamma1 / jnp.sqrt(var1 + eps)
    b1 = beta1 - mean1 * s1
    gamma2, beta2 = 1.0 - 0.05 * c, -0.03 * c
    mean2, var2 = -0.02 * c, 1.0 + 0.01 * c
    s2 = gamma2 / jnp.sqrt(var2 + eps)
    b2 = beta2 - mean2 * s2
    return (w1, s1, b1, w2, s2, b2)


if __name__ == "__main__":
    key = jax.random.PRNGKey(0)
    kx, kp = jax.random.split(key)

    N, C, H, W = 2, 8, 16, 16   # inplanes == planes; W*C = 128 -> lane-dense
    x = jax.random.normal(kx, (N, C, H, W), jnp.float32)
    params = make_params(kp, C)

    # One-time weight preparation (not on the per-call path).
    w1t, b1t, w2t, b2t = prepare_params(params, W)

    # Test-harness-only layout conversion: the hot path consumes/produces the
    # lane-dense (N, H, W*C) rows layout directly.
    x_rows = jnp.transpose(x, (0, 2, 3, 1)).reshape(N, H, W * C).astype(jnp.bfloat16)

    out_rows = jax.block_until_ready(basic_block_rows(x_rows, w1t, b1t, w2t, b2t))
    out = jnp.transpose(out_rows.reshape(N, H, W, C), (0, 3, 1, 2))   # test-only
    assert out.shape == (N, C, H, W)

    # Tight check vs a reference with matching operand precision (bf16 MXU
    # inputs, f32 accumulation and epilogue).
    ref_bf = reference_forward(x, params, bf16_operands=True)
    err_bf = float(jnp.max(jnp.abs(out - ref_bf)))
    assert jnp.allclose(out, ref_bf, rtol=1e-3, atol=1e-3), err_bf

    # Loose sanity check vs the full-f32 reference (difference is only the
    # bf16 rounding of the matmul operands / residual).
    ref_f32 = reference_forward(x, params, bf16_operands=False)
    err_f32 = float(jnp.max(jnp.abs(out - ref_f32)))
    assert jnp.allclose(out, ref_f32, rtol=1e-1, atol=1e-1), err_f32

    print("KERNEL_OK")
</pallas_src>

<mosaic_0001>
module attributes {stable_mosaic.version = 11 : i64} {
  func.func @basic_block_kernel(%arg0: i32, %arg1: memref<2x16x128xbf16, #tpu.memory_space<vmem>>, %arg2: memref<384x128xbf16, #tpu.memory_space<vmem>>, %arg3: memref<1x128xf32, #tpu.memory_space<vmem>>, %arg4: memref<384x128xbf16, #tpu.memory_space<vmem>>, %arg5: memref<1x128xf32, #tpu.memory_space<vmem>>, %arg6: memref<2x16x128xf32, #tpu.memory_space<vmem>>, %arg7: memref<2x18x128xf32, #tpu.memory_space<vmem>>, %arg8: memref<2x18x128xf32, #tpu.memory_space<vmem>>) attributes {dimension_semantics = [#tpu.dimension_semantics<parallel>], iteration_bounds = array<i64: 1>, scalar_prefetch = 0 : i64, scratch_operands = 2 : i64, tpu.core_type = #tpu.core_type<tc>, window_params = [{transform_indices = @transform_0, window_bounds = array<i64: 2, 16, 128>}, {pipeline_mode = #tpu.pipeline_mode<synchronous>, transform_indices = @transform_1, window_bounds = array<i64: 384, 128>}, {pipeline_mode = #tpu.pipeline_mode<synchronous>, transform_indices = @transform_2, window_bounds = array<i64: 1, 128>}, {pipeline_mode = #tpu.pipeline_mode<synchronous>, transform_indices = @transform_3, window_bounds = array<i64: 384, 128>}, {pipeline_mode = #tpu.pipeline_mode<synchronous>, transform_indices = @transform_4, window_bounds = array<i64: 1, 128>}, {transform_indices = @transform_5, window_bounds = array<i64: 2, 16, 128>}]} {
    %cst = arith.constant 0.000000e+00 : f32
    %0 = vector.broadcast %cst : f32 to vector<2x1x128xf32>
    %c0 = arith.constant 0 : index
    %c0_0 = arith.constant 0 : index
    %c0_1 = arith.constant 0 : index
    %1 = vector.load %arg7[%c0, %c0_0, %c0_1] : memref<2x18x128xf32, #tpu.memory_space<vmem>>, vector<2x1x128xf32>
    tpu.vector_store %arg7[%c0, %c0_0, %c0_1], %0 {strides = array<i32>} : memref<2x18x128xf32, #tpu.memory_space<vmem>>, vector<2x1x128xf32>,
    %c0_2 = arith.constant 0 : index
    %c17 = arith.constant 17 : index
    %c0_3 = arith.constant 0 : index
    %2 = vector.load %arg7[%c0_2, %c17, %c0_3] : memref<2x18x128xf32, #tpu.memory_space<vmem>>, vector<2x1x128xf32>
    tpu.vector_store %arg7[%c0_2, %c17, %c0_3], %0 {strides = array<i32>} : memref<2x18x128xf32, #tpu.memory_space<vmem>>, vector<2x1x128xf32>,
    %c0_4 = arith.constant 0 : index
    %c0_5 = arith.constant 0 : index
    %c0_6 = arith.constant 0 : index
    %3 = vector.load %arg8[%c0_4, %c0_5, %c0_6] : memref<2x18x128xf32, #tpu.memory_space<vmem>>, vector<2x1x128xf32>
    tpu.vector_store %arg8[%c0_4, %c0_5, %c0_6], %0 {strides = array<i32>} : memref<2x18x128xf32, #tpu.memory_space<vmem>>, vector<2x1x128xf32>,
    %c0_7 = arith.constant 0 : index
    %c17_8 = arith.constant 17 : index
    %c0_9 = arith.constant 0 : index
    %4 = vector.load %arg8[%c0_7, %c17_8, %c0_9] : memref<2x18x128xf32, #tpu.memory_space<vmem>>, vector<2x1x128xf32>
    tpu.vector_store %arg8[%c0_7, %c17_8, %c0_9], %0 {strides = array<i32>} : memref<2x18x128xf32, #tpu.memory_space<vmem>>, vector<2x1x128xf32>,
    %c0_10 = arith.constant 0 : index
    %c0_11 = arith.constant 0 : index
    %c0_12 = arith.constant 0 : index
    %5 = vector.load %arg1[%c0_10, %c0_11, %c0_12] : memref<2x16x128xbf16, #tpu.memory_space<vmem>>, vector<2x16x128xbf16>
    %6 = arith.extf %5 : vector<2x16x128xbf16> to vector<2x16x128xf32>
    %c0_13 = arith.constant 0 : index
    %c1 = arith.constant 1 : index
    %c0_14 = arith.constant 0 : index
    %7 = vector.load %arg7[%c0_13, %c1, %c0_14] : memref<2x18x128xf32, #tpu.memory_space<vmem>>, vector<2x16x128xf32>
    tpu.vector_store %arg7[%c0_13, %c1, %c0_14], %6 {strides = array<i32>} : memref<2x18x128xf32, #tpu.memory_space<vmem>>, vector<2x16x128xf32>,
    %c0_15 = arith.constant 0 : index
    %c0_16 = arith.constant 0 : index
    %c0_17 = arith.constant 0 : index
    %8 = vector.load %arg7[%c0_15, %c0_16, %c0_17] : memref<2x18x128xf32, #tpu.memory_space<vmem>>, vector<2x16x128xf32>
    %9 = vector.shape_cast %8 : vector<2x16x128xf32> to vector<32x128xf32>
    %10 = arith.truncf %9 : vector<32x128xf32> to vector<32x128xbf16>
    %c0_18 = arith.constant 0 : index
    %c0_19 = arith.constant 0 : index
    %11 = vector.load %arg2[%c0_18, %c0_19] : memref<384x128xbf16, #tpu.memory_space<vmem>>, vector<128x128xbf16>
    %cst_20 = arith.constant dense<0.000000e+00> : vector<32x128xf32>
    %12 = tpu.matmul %10, %11, %cst_20 {dimension_numbers = #tpu.dot_dimension_numbers<[1], [0], [0], [1], [0, 0, 1, 1], [], []>} : vector<32x128xbf16>, vector<128x128xbf16>, vector<32x128xf32> -> vector<32x128xf32>
    %c0_21 = arith.constant 0 : index
    %c1_22 = arith.constant 1 : index
    %c0_23 = arith.constant 0 : index
    %13 = vector.load %arg7[%c0_21, %c1_22, %c0_23] : memref<2x18x128xf32, #tpu.memory_space<vmem>>, vector<2x16x128xf32>
    %14 = vector.shape_cast %13 : vector<2x16x128xf32> to vector<32x128xf32>
    %15 = arith.truncf %14 : vector<32x128xf32> to vector<32x128xbf16>
    %c128 = arith.constant 128 : index
    %c0_24 = arith.constant 0 : index
    %16 = vector.load %arg2[%c128, %c0_24] : memref<384x128xbf16, #tpu.memory_space<vmem>>, vector<128x128xbf16>
    %cst_25 = arith.constant dense<0.000000e+00> : vector<32x128xf32>
    %17 = tpu.matmul %15, %16, %cst_25 {dimension_numbers = #tpu.dot_dimension_numbers<[1], [0], [0], [1], [0, 0, 1, 1], [], []>} : vector<32x128xbf16>, vector<128x128xbf16>, vector<32x128xf32> -> vector<32x128xf32>
    %18 = arith.addf %12, %17 : vector<32x128xf32>
    %c0_26 = arith.constant 0 : index
    %c2 = arith.constant 2 : index
    %c0_27 = arith.constant 0 : index
    %19 = vector.load %arg7[%c0_26, %c2, %c0_27] : memref<2x18x128xf32, #tpu.memory_space<vmem>>, vector<2x16x128xf32>
    %20 = vector.shape_cast %19 : vector<2x16x128xf32> to vector<32x128xf32>
    %21 = arith.truncf %20 : vector<32x128xf32> to vector<32x128xbf16>
    %c256 = arith.constant 256 : index
    %c0_28 = arith.constant 0 : index
    %22 = vector.load %arg2[%c256, %c0_28] : memref<384x128xbf16, #tpu.memory_space<vmem>>, vector<128x128xbf16>
    %cst_29 = arith.constant dense<0.000000e+00> : vector<32x128xf32>
    %23 = tpu.matmul %21, %22, %cst_29 {dimension_numbers = #tpu.dot_dimension_numbers<[1], [0], [0], [1], [0, 0, 1, 1], [], []>} : vector<32x128xbf16>, vector<128x128xbf16>, vector<32x128xf32> -> vector<32x128xf32>
    %24 = arith.addf %18, %23 : vector<32x128xf32>
    %c0_30 = arith.constant 0 : index
    %c0_31 = arith.constant 0 : index
    %25 = vector.load %arg3[%c0_30, %c0_31] : memref<1x128xf32, #tpu.memory_space<vmem>>, vector<1x128xf32>
    %26 = vector.broadcast %25 : vector<1x128xf32> to vector<32x128xf32>
    %27 = arith.addf %24, %26 : vector<32x128xf32>
    %cst_32 = arith.constant 0.000000e+00 : f32
    %28 = vector.broadcast %cst_32 : f32 to vector<32x128xf32>
    %29 = arith.maximumf %27, %28 : vector<32x128xf32>
    %30 = vector.shape_cast %29 : vector<32x128xf32> to vector<2x16x128xf32>
    %c0_33 = arith.constant 0 : index
    %c1_34 = arith.constant 1 : index
    %c0_35 = arith.constant 0 : index
    %31 = vector.load %arg8[%c0_33, %c1_34, %c0_35] : memref<2x18x128xf32, #tpu.memory_space<vmem>>, vector<2x16x128xf32>
    tpu.vector_store %arg8[%c0_33, %c1_34, %c0_35], %30 {strides = array<i32>} : memref<2x18x128xf32, #tpu.memory_space<vmem>>, vector<2x16x128xf32>,
    %c0_36 = arith.constant 0 : index
    %c0_37 = arith.constant 0 : index
    %c0_38 = arith.constant 0 : index
    %32 = vector.load %arg8[%c0_36, %c0_37, %c0_38] : memref<2x18x128xf32, #tpu.memory_space<vmem>>, vector<2x16x128xf32>
    %33 = vector.shape_cast %32 : vector<2x16x128xf32> to vector<32x128xf32>
    %34 = arith.truncf %33 : vector<32x128xf32> to vector<32x128xbf16>
    %c0_39 = arith.constant 0 : index
    %c0_40 = arith.constant 0 : index
    %35 = vector.load %arg4[%c0_39, %c0_40] : memref<384x128xbf16, #tpu.memory_space<vmem>>, vector<128x128xbf16>
    %cst_41 = arith.constant dense<0.000000e+00> : vector<32x128xf32>
    %36 = tpu.matmul %34, %35, %cst_41 {dimension_numbers = #tpu.dot_dimension_numbers<[1], [0], [0], [1], [0, 0, 1, 1], [], []>} : vector<32x128xbf16>, vector<128x128xbf16>, vector<32x128xf32> -> vector<32x128xf32>
    %c0_42 = arith.constant 0 : index
    %c1_43 = arith.constant 1 : index
    %c0_44 = arith.constant 0 : index
    %37 = vector.load %arg8[%c0_42, %c1_43, %c0_44] : memref<2x18x128xf32, #tpu.memory_space<vmem>>, vector<2x16x128xf32>
    %38 = vector.shape_cast %37 : vector<2x16x128xf32> to vector<32x128xf32>
    %39 = arith.truncf %38 : vector<32x128xf32> to vector<32x128xbf16>
    %c128_45 = arith.constant 128 : index
    %c0_46 = arith.constant 0 : index
    %40 = vector.load %arg4[%c128_45, %c0_46] : memref<384x128xbf16, #tpu.memory_space<vmem>>, vector<128x128xbf16>
    %cst_47 = arith.constant dense<0.000000e+00> : vector<32x128xf32>
    %41 = tpu.matmul %39, %40, %cst_47 {dimension_numbers = #tpu.dot_dimension_numbers<[1], [0], [0], [1], [0, 0, 1, 1], [], []>} : vector<32x128xbf16>, vector<128x128xbf16>, vector<32x128xf32> -> vector<32x128xf32>
    %42 = arith.addf %36, %41 : vector<32x128xf32>
    %c0_48 = arith.constant 0 : index
    %c2_49 = arith.constant 2 : index
    %c0_50 = arith.constant 0 : index
    %43 = vector.load %arg8[%c0_48, %c2_49, %c0_50] : memref<2x18x128xf32, #tpu.memory_space<vmem>>, vector<2x16x128xf32>
    %44 = vector.shape_cast %43 : vector<2x16x128xf32> to vector<32x128xf32>
    %45 = arith.truncf %44 : vector<32x128xf32> to vector<32x128xbf16>
    %c256_51 = arith.constant 256 : index
    %c0_52 = arith.constant 0 : index
    %46 = vector.load %arg4[%c256_51, %c0_52] : memref<384x128xbf16, #tpu.memory_space<vmem>>, vector<128x128xbf16>
    %cst_53 = arith.constant dense<0.000000e+00> : vector<32x128xf32>
    %47 = tpu.matmul %45, %46, %cst_53 {dimension_numbers = #tpu.dot_dimension_numbers<[1], [0], [0], [1], [0, 0, 1, 1], [], []>} : vector<32x128xbf16>, vector<128x128xbf16>, vector<32x128xf32> -> vector<32x128xf32>
    %48 = arith.addf %42, %47 : vector<32x128xf32>
    %c0_54 = arith.constant 0 : index
    %c0_55 = arith.constant 0 : index
    %49 = vector.load %arg5[%c0_54, %c0_55] : memref<1x128xf32, #tpu.memory_space<vmem>>, vector<1x128xf32>
    %50 = vector.broadcast %49 : vector<1x128xf32> to vector<32x128xf32>
    %51 = arith.addf %48, %50 : vector<32x128xf32>
    %c0_56 = arith.constant 0 : index
    %c0_57 = arith.constant 0 : index
    %c0_58 = arith.constant 0 : index
    %52 = vector.load %arg1[%c0_56, %c0_57, %c0_58] : memref<2x16x128xbf16, #tpu.memory_space<vmem>>, vector<2x16x128xbf16>
    %53 = arith.extf %52 : vector<2x16x128xbf16> to vector<2x16x128xf32>
    %54 = vector.shape_cast %53 : vector<2x16x128xf32> to vector<32x128xf32>
    %55 = arith.addf %51, %54 : vector<32x128xf32>
    %cst_59 = arith.constant 0.000000e+00 : f32
    %56 = vector.broadcast %cst_59 : f32 to vector<32x128xf32>
    %57 = arith.maximumf %55, %56 : vector<32x128xf32>
    %58 = vector.shape_cast %57 : vector<32x128xf32> to vector<2x16x128xf32>
    %c0_60 = arith.constant 0 : index
    %c0_61 = arith.constant 0 : index
    %c0_62 = arith.constant 0 : index
    %59 = vector.load %arg6[%c0_60, %c0_61, %c0_62] : memref<2x16x128xf32, #tpu.memory_space<vmem>>, vector<2x16x128xf32>
    tpu.vector_store %arg6[%c0_60, %c0_61, %c0_62], %58 {strides = array<i32>} : memref<2x16x128xf32, #tpu.memory_space<vmem>>, vector<2x16x128xf32>,
    return
  }
  func.func @transform_0(%arg0: i32) -> (i32, i32, i32) {
    %c0_i32 = arith.constant 0 : i32
    %c0_i32_0 = arith.constant 0 : i32
    %c0_i32_1 = arith.constant 0 : i32
    return %arg0, %c0_i32, %c0_i32_0 : i32, i32, i32
  }
  func.func @transform_1(%arg0: i32) -> (i32, i32) {
    %c0_i32 = arith.constant 0 : i32
    %c0_i32_0 = arith.constant 0 : i32
    %c0_i32_1 = arith.constant 0 : i32
    return %c0_i32, %c0_i32_0 : i32, i32
  }
  func.func @transform_2(%arg0: i32) -> (i32, i32) {
    %c0_i32 = arith.constant 0 : i32
    %c0_i32_0 = arith.constant 0 : i32
    %c0_i32_1 = arith.constant 0 : i32
    return %c0_i32, %c0_i32_0 : i32, i32
  }
  func.func @transform_3(%arg0: i32) -> (i32, i32) {
    %c0_i32 = arith.constant 0 : i32
    %c0_i32_0 = arith.constant 0 : i32
    %c0_i32_1 = arith.constant 0 : i32
    return %c0_i32, %c0_i32_0 : i32, i32
  }
  func.func @transform_4(%arg0: i32) -> (i32, i32) {
    %c0_i32 = arith.constant 0 : i32
    %c0_i32_0 = arith.constant 0 : i32
    %c0_i32_1 = arith.constant 0 : i32
    return %c0_i32, %c0_i32_0 : i32, i32
  }
  func.func @transform_5(%arg0: i32) -> (i32, i32, i32) {
    %c0_i32 = arith.constant 0 : i32
    %c0_i32_0 = arith.constant 0 : i32
    %c0_i32_1 = arith.constant 0 : i32
    return %arg0, %c0_i32, %c0_i32_0 : i32, i32, i32
  }
}

</mosaic_0001>

<bundles_post_ra>
// kernel: basic_block_rows.1
= control target key start
LH: loop header
LB: loop body
LE: loop exit
PB: predicated region body
PF: predicated region fallthrough
CT: control target
= control target key end

     0   :  { %10 = vsyncpa [#allocation5], 0  ;;  %s1347_s0 = inlined_call_operand.hbm [shape: bf16[2,16,128], index: 0, kind: input, shape index: {}]   ;;  %s1348_s1 = inlined_call_operand.hbm [shape: bf16[384,128], index: 1, kind: input, shape index: {}]   ;;  %s1349_s2 = inlined_call_operand.vmem [shape: f32[1,128], index: 2, kind: input, shape index: {}]   ;;  %s1350_s3 = inlined_call_operand.hbm [shape: bf16[384,128], index: 3, kind: input, shape index: {}]   ;;  %s1351_s4 = inlined_call_operand.vmem [shape: f32[1,128], index: 4, kind: input, shape index: {}]   ;;  %s1352_s5 = inlined_call_operand.hbm [shape: f32[2,16,128], index: 5, kind: output, shape index: {}]  }
   0x1   :  { %11 = vsyncpa [#allocation8], 0 }
   0x2   :  { %12 = vsyncpa [#allocation6], 0  ;;  %s1266_s18 = smov [#allocation7]   ;;  %s1267_s20 = smov [#allocation4]  }
   0x3   :  { %s30_s19 = sshll.u32 %s1266_s18, 4  ;;  %s18_s21 = sshll.u32 %s1267_s20, 4  ;;  %s31_s19 = int_to_ptr.vmem [resolvable:$true] %s30_s19  ;;  %s19_s21 = int_to_ptr.vmem [resolvable:$true] %s18_s21 }
   0x4   :  { %s1188_s22 = scalar_lea.vmem %s31_s19, 3072  ;;  %p1193_p1 = scmp.lt.s32.totalorder %s31_s19, %s31_s19 }
   0x5   :  { %p1189_p0 = scmp.ne.s32.totalorder %s31_s19, %s1188_s22  ;;  %p1194_p2 = scmp.lt.s32.totalorder %s1188_s22, %s1188_s22 }
   0x7   :  { %p1195_p3 = por %p1194_p2, %p1193_p1 }
   0x9   :  { %p1196_p4 = pnand %p1195_p3, %p1189_p0 }
   0xb   :  { %1199 = shalt.err (!%p1196_p4)
}
   0xc   :  { %s1268_s23 = smov 64   ;;  %s1269_s24 = smov 4  }
   0xd   :  { %36 = dma.hbm_to_vmem [thread:$0]  %s1348_s1, 3072, %s31_s19, [#allocation8], %s1268_s23, %s1268_s23, %s1269_s24  }
   0xe   :  { %s1208_s27 = scalar_lea.vmem %s19_s21, 256  ;;  %p1213_p6 = scmp.lt.s32.totalorder %s19_s21, %s19_s21 }
   0xf   :  { %p1209_p5 = scmp.ne.s32.totalorder %s19_s21, %s1208_s27  ;;  %p1214_p7 = scmp.lt.s32.totalorder %s1208_s27, %s1208_s27 }
  0x11   :  { %p1215_p8 = por %p1214_p7, %p1213_p6 }
  0x13   :  { %p1216_p9 = pnand %p1215_p8, %p1209_p5 }
  0x15   :  { %1219 = shalt.err (!%p1216_p9)
}
  0x16   :  { %24 = dma.hbm_to_vmem [thread:$0]  %s1347_s0, 256, %s19_s21, [#allocation5], %s1268_s23, %s1268_s23, %s1269_s24  }
  0x17   :  { %s1270_s30 = smov [#allocation9]  }
  0x18   :  { %s44_s6 = sshll.u32 %s1270_s30, 4  ;;  %s45_s6 = int_to_ptr.vmem [resolvable:$true] %s44_s6 }
  0x19   :  { %s1228_s7 = scalar_lea.vmem %s45_s6, 3072  ;;  %p1233_p11 = scmp.lt.s32.totalorder %s45_s6, %s45_s6 }
  0x1a   :  { %p1229_p10 = scmp.ne.s32.totalorder %s45_s6, %s1228_s7  ;;  %p1234_p12 = scmp.lt.s32.totalorder %s1228_s7, %s1228_s7 }
  0x1c   :  { %p1235_p13 = por %p1234_p12, %p1233_p11 }
  0x1e   :  { %p1236_p0 = pnand %p1235_p13, %p1229_p10 }
  0x20   :  { %1239 = shalt.err (!%p1236_p0)
}
  0x21   :  { %50 = dma.hbm_to_vmem [thread:$0]  %s1350_s3, 3072, %s45_s6, [#allocation8], %s1268_s23, %s1268_s23, %s1269_s24  }
  0x22   :  { %1260 = dma.done.wait [#allocation5], 256  }
  0x23   :  { %1261 = vsyncadd [#allocation5], 4294967040 }
  0x24   :  { %1262 = dma.done.wait [#allocation8], 6144  }
  0x25   :  { %1263 = vsyncadd [#allocation8], 4294961152  ;;  %v1271_v0 = vmov 0.0   ;;  %v1130_v1 = vld [vmem:[#allocation7 + $0x78] sm:$0xff]   ;;  %v1132_v3 = vld [vmem:[#allocation7 + $0x70] sm:$0xff]  }
  0x26   :  { %63 = vst [vmem:[#allocation2] sm:$0x1] %v1271_v0  ;;  %64 = vst [vmem:[#allocation2 + $0x18] sm:$0x1] %v1271_v0  ;;  %v1131_v2 = vld [vmem:[#allocation7 + $0x38] sm:$0xff]   ;;  %1001 = vmatprep.subr.bf16.mxu0 %v1130_v1  ;;  %v1133_v4 = vld [vmem:[#allocation7 + $0x30] sm:$0xff]  }
  0x27   :  { %65 = vst [vmem:[#allocation2 + $0x11] sm:$0x1] %v1271_v0  ;;  %66 = vst [vmem:[#allocation2 + $0x29] sm:$0x1] %v1271_v0  ;;  %1021 = vmatprep.subr.bf16.mxu1 %v1131_v2  ;;  %1002 = vmatpush3.bf16.msra.mxu0 %v1130_v1  ;;  %v1134_v5 = vld [vmem:[#allocation7 + $0x68] sm:$0xff]   ;;  %v1136_v7 = vld [vmem:[#allocation7 + $0x60] sm:$0xff]  }
  0x28   :  { %67 = vst [vmem:[#allocation3] sm:$0x1] %v1271_v0  ;;  %68 = vst [vmem:[#allocation3 + $0x18] sm:$0x1] %v1271_v0  ;;  %1022 = vmatpush3.bf16.msra.mxu1 %v1131_v2  ;;  %1003 = vmatprep.subr.bf16.mxu0 %v1132_v3  ;;  %v1135_v6 = vld [vmem:[#allocation7 + $0x28] sm:$0xff]   ;;  %v1137_v8 = vld [vmem:[#allocation7 + $0x20] sm:$0xff]  }
  0x29   :  { %69 = vst [vmem:[#allocation3 + $0x11] sm:$0x1] %v1271_v0  ;;  %70 = vst [vmem:[#allocation3 + $0x29] sm:$0x1] %v1271_v0  ;;  %1023 = vmatprep.subr.bf16.mxu1 %v1133_v4  ;;  %v1138_v9 = vld [vmem:[#allocation7 + $0x58] sm:$0xff]   ;;  %v1140_v11 = vld [vmem:[#allocation7 + $0x50] sm:$0xff]  }
  0x2a   :  { %v1139_v10 = vld [vmem:[#allocation7 + $0x18] sm:$0xff]   ;;  %v1314_v12 = vld [vmem:[#allocation4] sm:$0xff]   ;;  %v1142_v20 = vld [vmem:[#allocation7 + $0x48] sm:$0xff]  }
  0x2b   :  { %1004 = vmatpush3.bf16.msra.mxu0 %v1132_v3  ;;  %v1146_v13 = vld [vmem:[#allocation4] sm:$0xff]  ;;  %v1316_v14 = vld [vmem:[#allocation4 + $0x8] sm:$0xff]   ;;  %v925_v16 = vunpack.c.l.bf16 %v1314_v12  ;;  %v926_v17 = vunpack.c.h.bf16 %v1314_v12  ;;  %v1143_v21 = vld [vmem:[#allocation7 + $0x8] sm:$0xff]  }
  0x2c   :  { %1024 = vmatpush3.bf16.msra.mxu1 %v1133_v4  ;;  %1005 = vmatprep.subr.bf16.mxu0 %v1134_v5  ;;  %v1141_v15 = vld [vmem:[#allocation7 + $0x10] sm:$0xff]   ;;  %v929_v18 = vunpack.c.l.bf16 %v1316_v14  ;;  %v930_v19 = vunpack.c.h.bf16 %v1316_v14  ;;  %v1144_v22 = vld [vmem:[#allocation7 + $0x40] sm:$0xff]   ;;  %v1148_v29 = vld [vmem:[#allocation7 + $0xb8] sm:$0xff]  }
  0x2d   :  { %1025 = vmatprep.subr.bf16.mxu1 %v1135_v6  ;;  %1017 = vmatprep.mubr.bf16.mxu0 %v1146_v13  ;;  %79 = vst [vmem:[#allocation2 + $0x1] sm:$0xff] %v925_v16  ;;  %80 = vst [vmem:[#allocation2 + $0x9] sm:$0xff] %v926_v17  ;;  %v1145_v23 = vld [vmem:[#allocation7] sm:$0xff]   ;;  %v1147_v30 = vld [vmem:[#allocation4 + $0x8] sm:$0xff] }
  0x2e   :  { %81 = vst [vmem:[#allocation2 + $0x19] sm:$0xff] %v929_v18  ;;  %82 = vst [vmem:[#allocation2 + $0x21] sm:$0xff] %v930_v19  ;;  %v1149_v33 = vld [vmem:[#allocation7 + $0xb0] sm:$0xff]   ;;  %v1150_v36 = vld [vmem:[#allocation7 + $0xa8] sm:$0xff]  }
  0x2f   :  { %1006 = vmatpush3.bf16.msra.mxu0 %v1134_v5  ;;  %v1151_v37 = vld [vmem:[#allocation7 + $0xa0] sm:$0xff]   ;;  %v1152_v38 = vld [vmem:[#allocation7 + $0x98] sm:$0xff]   ;;  %v1153_v39 = vld [vmem:[#allocation7 + $0x90] sm:$0xff]  }
  0x30   :  { %1026 = vmatpush3.bf16.msra.mxu1 %v1135_v6  ;;  %1007 = vmatprep.subr.bf16.mxu0 %v1136_v7  ;;  %v1154_v40 = vld [vmem:[#allocation7 + $0x88] sm:$0xff]   ;;  %v1155_v41 = vld [vmem:[#allocation7 + $0x80] sm:$0xff]   ;;  %v1156_v45 = vld [vmem:[#allocation9 + $0x78] sm:$0xff]  }
  0x31   :  { %1027 = vmatprep.subr.bf16.mxu1 %v1137_v8  ;;  %v1157_v46 = vld [vmem:[#allocation9 + $0x38] sm:$0xff]   ;;  %v1158_v47 = vld [vmem:[#allocation9 + $0x70] sm:$0xff]   ;;  %v1160_v49 = vld [vmem:[#allocation9 + $0x68] sm:$0xff]  }
  0x32   :  { %v1159_v48 = vld [vmem:[#allocation9 + $0x30] sm:$0xff]   ;;  %v1162_v50 = vld [vmem:[#allocation9 + $0x60] sm:$0xff]   ;;  %v1164_v51 = vld [vmem:[#allocation9 + $0x58] sm:$0xff]  }
  0x33   :  { %1008 = vmatpush3.bf16.msra.mxu0 %v1136_v7  ;;  %v1161_v52 = vld [vmem:[#allocation9 + $0x28] sm:$0xff]   ;;  %v1166_v53 = vld [vmem:[#allocation9 + $0x50] sm:$0xff]   ;;  %v1163_v54 = vld [vmem:[#allocation9 + $0x20] sm:$0xff]  }
  0x34   :  { %1028 = vmatpush3.bf16.msra.mxu1 %v1137_v8  ;;  %1009 = vmatprep.subr.bf16.mxu0 %v1138_v9  ;;  %v83_v24 = vld [vmem:[#allocation2] sm:$0xff]  ;;  %v84_v25 = vld [vmem:[#allocation2 + $0x8] sm:$0xff]  ;;  %v1168_v55 = vld [vmem:[#allocation9 + $0x48] sm:$0xff]  }
  0x35   :  { %1029 = vmatprep.subr.bf16.mxu1 %v1139_v10  ;;  %v87_v26 = vpack.c.bf16 %v84_v25, %v83_v24  ;;  %v85_v27 = vld [vmem:[#allocation2 + $0x18] sm:$0xff]  ;;  %v86_v28 = vld [vmem:[#allocation2 + $0x20] sm:$0xff]  ;;  %v322_v32 = vld [vmem:[#allocation2 + $0xa] sm:$0xff] }
  0x36   :  { %v321_v31 = vld [vmem:[#allocation2 + $0x2] sm:$0xff]  ;;  %v88_v34 = vpack.c.bf16 %v86_v28, %v85_v27  ;;  %v323_v42 = vld [vmem:[#allocation2 + $0x1a] sm:$0xff]  ;;  %v1170_v57 = vld [vmem:[#allocation9 + $0x40] sm:$0xff]  }
  0x37   :  { %1010 = vmatpush3.bf16.msra.mxu0 %v1138_v9  ;;  %1037 = vmatprep.mubr.bf16.mxu1 %v87_v26  ;;  %v325_v35 = vpack.c.bf16 %v322_v32, %v321_v31  ;;  %v324_v43 = vld [vmem:[#allocation2 + $0x22] sm:$0xff]  ;;  %v1169_v59 = vld [vmem:[#allocation9 + $0x8] sm:$0xff]   ;;  %v1171_v61 = vld [vmem:[#allocation9] sm:$0xff]  }
  0x38   :  { %1030 = vmatpush3.bf16.msra.mxu1 %v1139_v10  ;;  %1011 = vmatprep.subr.bf16.mxu0 %v1140_v11  ;;  %v326_v44 = vpack.c.bf16 %v324_v43, %v323_v42  ;;  %v1165_v56 = vld [vmem:[#allocation9 + $0x18] sm:$0xff]   ;;  %v1167_v58 = vld [vmem:[#allocation9 + $0x10] sm:$0xff]  }
  0x39   :  { %1031 = vmatprep.subr.bf16.mxu1 %v1141_v15  ;;  %v1172_v60 = vld [vmem:[#allocation9 + $0xb8] sm:$0xff]   ;;  %v897_v7 = vld [vmem:[%s1349_s2] ss:$0 sm:$0xff] }
  0x3b   :  { %1012 = vmatpush3.bf16.msra.mxu0 %v1140_v11 }
  0x3c   :  { %1032 = vmatpush3.bf16.msra.mxu1 %v1141_v15  ;;  %1013 = vmatprep.subr.bf16.mxu0 %v1142_v20 }
  0x3d   :  { %1033 = vmatprep.subr.bf16.mxu1 %v1143_v21 }
  0x3f   :  { %1014 = vmatpush3.bf16.msra.mxu0 %v1142_v20 }
  0x40   :  { %1034 = vmatpush3.bf16.msra.mxu1 %v1143_v21  ;;  %1015 = vmatprep.subr.bf16.mxu0 %v1144_v22 }
  0x41   :  { %1035 = vmatprep.subr.bf16.mxu1 %v1145_v23 }
  0x43   :  { %1016 = vmatpush3.bf16.msra.mxu0 %v1144_v22 }
  0x44   :  { %1036 = vmatpush3.bf16.msra.mxu1 %v1145_v23  ;;  %1041 = vmatprep.subr.bf16.mxu0 %v1148_v29 }
  0x45   :  { %1061 = vmatprep.subr.bf16.mxu1 %v1156_v45 }
  0x46   :  { %1018 = vmatmul.mubr.bf16.vlgmr.msra.gmra.mxu0 %v1147_v30 }
  0x47   :  { %1038 = vmatmul.mubr.bf16.vlgmr.msra.gmra.mxu1 %v88_v34  ;;  %1042 = vmatpush3.bf16.msra.mxu0 %v1148_v29 }
  0x48   :  { %1043 = vmatprep.subr.bf16.mxu0 %v1149_v33  ;;  %1057 = vmatprep.mubr.bf16.mxu0 %v325_v35  ;;  %v1173_v35 = vld [vmem:[#allocation9 + $0xb0] sm:$0xff]  }
  0x49   :  { %1062 = vmatpush3.bf16.msra.mxu1 %v1156_v45 }
  0x4a   :  { %1063 = vmatprep.subr.bf16.mxu1 %v1158_v47 }
  0x4b   :  { %1044 = vmatpush3.bf16.msra.mxu0 %v1149_v33 }
  0x4c   :  { %1045 = vmatprep.subr.bf16.mxu0 %v1150_v36 }
  0x4d   :  { %1064 = vmatpush3.bf16.msra.mxu1 %v1158_v47  ;;  %v1176_v47 = vld [vmem:[#allocation9 + $0x98] sm:$0xff]  }
  0x4e   :  { %1065 = vmatprep.subr.bf16.mxu1 %v1160_v49 }
  0x4f   :  { %1046 = vmatpush3.bf16.msra.mxu0 %v1150_v36  ;;  %v1174_v36 = vld [vmem:[#allocation9 + $0xa8] sm:$0xff]  }
  0x50   :  { %1047 = vmatprep.subr.bf16.mxu0 %v1151_v37 }
  0x51   :  { %1066 = vmatpush3.bf16.msra.mxu1 %v1160_v49  ;;  %v1178_v49 = vld [vmem:[#allocation9 + $0x88] sm:$0xff]  }
  0x52   :  { %1067 = vmatprep.subr.bf16.mxu1 %v1162_v50 }
  0x53   :  { %1048 = vmatpush3.bf16.msra.mxu0 %v1151_v37 }
  0x54   :  { %1049 = vmatprep.subr.bf16.mxu0 %v1152_v38 }
  0x55   :  { %1068 = vmatpush3.bf16.msra.mxu1 %v1162_v50  ;;  %v1179_v50 = vld [vmem:[#allocation9 + $0x80] sm:$0xff]  }
  0x56   :  { %1069 = vmatprep.subr.bf16.mxu1 %v1164_v51 }
  0x57   :  { %1050 = vmatpush3.bf16.msra.mxu0 %v1152_v38 }
  0x58   :  { %1051 = vmatprep.subr.bf16.mxu0 %v1153_v39 }
  0x59   :  { %1070 = vmatpush3.bf16.msra.mxu1 %v1164_v51 }
  0x5a   :  { %1071 = vmatprep.subr.bf16.mxu1 %v1166_v53 }
  0x5b   :  { %1052 = vmatpush3.bf16.msra.mxu0 %v1153_v39 }
  0x5c   :  { %1053 = vmatprep.subr.bf16.mxu0 %v1154_v40 }
  0x5d   :  { %1072 = vmatpush3.bf16.msra.mxu1 %v1166_v53 }
  0x5e   :  { %1073 = vmatprep.subr.bf16.mxu1 %v1168_v55 }
  0x5f   :  { %1054 = vmatpush3.bf16.msra.mxu0 %v1154_v40 }
  0x60   :  { %1055 = vmatprep.subr.bf16.mxu0 %v1155_v41 }
  0x61   :  { %1074 = vmatpush3.bf16.msra.mxu1 %v1168_v55 }
  0x62   :  { %1075 = vmatprep.subr.bf16.mxu1 %v1170_v57 }
  0x63   :  { %1056 = vmatpush3.bf16.msra.mxu0 %v1155_v41 }
  0x64   :  { %1081 = vmatprep.subr.bf16.mxu0 %v1157_v46 }
  0x65   :  { %1076 = vmatpush3.bf16.msra.mxu1 %v1170_v57 }
  0x66   :  { %1058 = vmatmul.mubr.bf16.vlgmr.msra.gmra.mxu0 %v326_v44  ;;  %1101 = vmatprep.subr.bf16.mxu1 %v1172_v60 }
  0x67   :  { %1082 = vmatpush3.bf16.msra.mxu0 %v1157_v46  ;;  %v1175_v46 = vld [vmem:[#allocation9 + $0xa0] sm:$0xff]  }
  0x68   :  { %1083 = vmatprep.subr.bf16.mxu0 %v1159_v48 }
  0x6b   :  { %1084 = vmatpush3.bf16.msra.mxu0 %v1159_v48  ;;  %v1177_v48 = vld [vmem:[#allocation9 + $0x90] sm:$0xff]  }
  0x6c   :  { %1085 = vmatprep.subr.bf16.mxu0 %v1161_v52 }
  0x6f   :  { %1086 = vmatpush3.bf16.msra.mxu0 %v1161_v52 }
  0x70   :  { %1087 = vmatprep.subr.bf16.mxu0 %v1163_v54 }
  0x73   :  { %1088 = vmatpush3.bf16.msra.mxu0 %v1163_v54 }
  0x74   :  { %1089 = vmatprep.subr.bf16.mxu0 %v1165_v56 }
  0x77   :  { %1090 = vmatpush3.bf16.msra.mxu0 %v1165_v56 }
  0x78   :  { %1091 = vmatprep.subr.bf16.mxu0 %v1167_v58 }
  0x7b   :  { %1092 = vmatpush3.bf16.msra.mxu0 %v1167_v58 }
  0x7c   :  { %1093 = vmatprep.subr.bf16.mxu0 %v1169_v59 }
  0x7f   :  { %1094 = vmatpush3.bf16.msra.mxu0 %v1169_v59 }
  0x80   :  { %1095 = vmatprep.subr.bf16.mxu0 %v1171_v61 }
  0x83   :  { %1096 = vmatpush3.bf16.msra.mxu0 %v1171_v61 }
 0x106   :  { %v1019_v62 = vpop.f32.mrf.mxu0 }
 0x107   :  { %v1039_v63 = vpop.f32.mrf.mxu1 }
 0x108   :  { %v209_v0 = vpop.f32.mrf.mxu0  ;;  %v315_v5 = vadd.f32 %v1039_v63, %v1019_v62  ;;  %v922_v63 = vld [vmem:[%s1351_s4] ss:$0 sm:$0xff]  ;;  %s1272_s4 = smov [#allocation10]  }
 0x109   :  { %v306_v1 = vpop.f32.mrf.mxu1  ;;  %s860_s10 = sshll.u32 %s1272_s4, 4  ;;  %s861_s10 = int_to_ptr.vmem [resolvable:$true] %s860_s10 }
 0x10a   :  { %v1020_v2 = vpop.f32.mrf.mxu0  ;;  %v307_v8 = vadd.f32 %v306_v1, %v209_v0  ;;  %s1240_s11 = scalar_lea.vmem %s861_s10, 512  ;;  %p1245_p2 = scmp.lt.s32.totalorder %s861_s10, %s861_s10 }
 0x10b   :  { %v1040_v3 = vpop.f32.mrf.mxu1  ;;  %p1241_p1 = scmp.ne.s32.totalorder %s861_s10, %s1240_s11  ;;  %p1246_p3 = scmp.lt.s32.totalorder %s1240_s11, %s1240_s11 }
 0x10c   :  { %v212_v4 = vpop.f32.mrf.mxu0  ;;  %v318_v13 = vadd.f32 %v1040_v3, %v1020_v2 }
 0x10d   :  { %v309_v10 = vpop.f32.mrf.mxu1  ;;  %p1247_p4 = por %p1246_p3, %p1245_p2 }
 0x10e   :  { %v310_v22 = vadd.f32 %v309_v10, %v212_v4 }
 0x10f   :  { %p1248_p5 = pnand %p1247_p4, %p1241_p1 }
 0x126   :  { %v1059_v6 = vpop.f32.mrf.mxu0 }
 0x127   :  { %v442_v9 = vadd.f32 %v1059_v6, %v315_v5 }
 0x128   :  { %v425_v11 = vpop.f32.mrf.mxu0 }
 0x129   :  { %v453_v15 = vadd.f32 %v897_v7, %v442_v9  ;;  %v440_v20 = vadd.f32 %v425_v11, %v307_v8 }
 0x12a   :  { %v1060_v21 = vpop.f32.mrf.mxu0 }
 0x12b   :  { %v457_v23 = vmax.f32 %v453_v15, 0.0  ;;  %v451_v24 = vadd.f32 %v897_v7, %v440_v20  ;;  %v443_v25 = vadd.f32 %v1060_v21, %v318_v13 }
 0x12c   :  { %v428_v26 = vpop.f32.mrf.mxu0 }
 0x12d   :  { %461 = vst [vmem:[#allocation3 + $0x19] sm:$0xff] %v457_v23  ;;  %v455_v27 = vmax.f32 %v451_v24, 0.0  ;;  %v454_v28 = vadd.f32 %v897_v7, %v443_v25  ;;  %v441_v29 = vadd.f32 %v428_v26, %v310_v22 }
 0x12f   :  { %459 = vst [vmem:[#allocation3 + $0x1] sm:$0xff] %v455_v27  ;;  %v458_v30 = vmax.f32 %v454_v28, 0.0  ;;  %v452_v31 = vadd.f32 %v897_v7, %v441_v29 }
 0x131   :  { %462 = vst [vmem:[#allocation3 + $0x21] sm:$0xff] %v458_v30  ;;  %v456_v32 = vmax.f32 %v452_v31, 0.0  ;;  %v490_v34 = vpack.c.bf16 %v458_v30, %v457_v23 }
 0x133   :  { %460 = vst [vmem:[#allocation3 + $0x9] sm:$0xff] %v456_v32  ;;  %v489_v33 = vpack.c.bf16 %v456_v32, %v455_v27 }
 0x134   :  { %v465_v43 = vld [vmem:[#allocation3 + $0x18] sm:$0xff] }
 0x135   :  { %1077 = vmatprep.mubr.bf16.mxu1 %v489_v33 }
 0x136   :  { %1078 = vmatmul.mubr.bf16.vlgmr.msra.gmra.mxu1 %v490_v34  ;;  %v463_v37 = vld [vmem:[#allocation3] sm:$0xff] }
 0x137   :  { %1102 = vmatpush3.bf16.msra.mxu1 %v1172_v60 }
 0x138   :  { %1103 = vmatprep.subr.bf16.mxu1 %v1173_v35  ;;  %v466_v38 = vld [vmem:[#allocation3 + $0x20] sm:$0xff] }
 0x139   :  { %v468_v45 = vpack.c.bf16 %v466_v38, %v465_v43  ;;  %v703_v51 = vld [vmem:[#allocation3 + $0x1a] sm:$0xff]  ;;  %v704_v52 = vld [vmem:[#allocation3 + $0x22] sm:$0xff] }
 0x13a   :  { %v464_v39 = vld [vmem:[#allocation3 + $0x8] sm:$0xff]  ;;  %v706_v53 = vpack.c.bf16 %v704_v52, %v703_v51 }
 0x13b   :  { %v701_v40 = vld [vmem:[#allocation3 + $0x2] sm:$0xff]  ;;  %v702_v41 = vld [vmem:[#allocation3 + $0xa] sm:$0xff]  ;;  %v467_v42 = vpack.c.bf16 %v464_v39, %v463_v37  ;;  %1104 = vmatpush3.bf16.msra.mxu1 %v1173_v35 }
 0x13c   :  { %v705_v44 = vpack.c.bf16 %v702_v41, %v701_v40  ;;  %1105 = vmatprep.subr.bf16.mxu1 %v1174_v36 }
 0x13d   :  { %1097 = vmatprep.mubr.bf16.mxu0 %v467_v42 }
 0x13e   :  { %1117 = vmatprep.mubr.bf16.mxu1 %v705_v44  ;;  %1098 = vmatmul.mubr.bf16.vlgmr.msra.gmra.mxu0 %v468_v45 }
 0x13f   :  { %1106 = vmatpush3.bf16.msra.mxu1 %v1174_v36 }
 0x140   :  { %1107 = vmatprep.subr.bf16.mxu1 %v1175_v46 }
 0x143   :  { %1108 = vmatpush3.bf16.msra.mxu1 %v1175_v46 }
 0x144   :  { %1109 = vmatprep.subr.bf16.mxu1 %v1176_v47 }
 0x147   :  { %1110 = vmatpush3.bf16.msra.mxu1 %v1176_v47 }
 0x148   :  { %1111 = vmatprep.subr.bf16.mxu1 %v1177_v48 }
 0x14b   :  { %1112 = vmatpush3.bf16.msra.mxu1 %v1177_v48 }
 0x14c   :  { %1113 = vmatprep.subr.bf16.mxu1 %v1178_v49 }
 0x14f   :  { %1114 = vmatpush3.bf16.msra.mxu1 %v1178_v49 }
 0x150   :  { %1115 = vmatprep.subr.bf16.mxu1 %v1179_v50 }
 0x153   :  { %1116 = vmatpush3.bf16.msra.mxu1 %v1179_v50 }
 0x156   :  { %1118 = vmatmul.mubr.bf16.vlgmr.msra.gmra.mxu1 %v706_v53 }
 0x1f6   :  { %v1079_v54 = vpop.f32.mrf.mxu1 }
 0x1f8   :  { %v589_v56 = vpop.f32.mrf.mxu1 }
 0x1fa   :  { %v1080_v58 = vpop.f32.mrf.mxu1 }
 0x1fc   :  { %v592_v60 = vpop.f32.mrf.mxu1 }
 0x1fe   :  { %v1099_v55 = vpop.f32.mrf.mxu0 }
 0x1ff   :  { %v695_v61 = vadd.f32 %v1099_v55, %v1079_v54 }
 0x200   :  { %v686_v57 = vpop.f32.mrf.mxu0 }
 0x201   :  { %v687_v0 = vadd.f32 %v686_v57, %v589_v56 }
 0x202   :  { %v1100_v59 = vpop.f32.mrf.mxu0 }
 0x203   :  { %v698_v4 = vadd.f32 %v1100_v59, %v1080_v58 }
 0x204   :  { %v689_v2 = vpop.f32.mrf.mxu0 }
 0x205   :  { %v690_v8 = vadd.f32 %v689_v2, %v592_v60 }
 0x216   :  { %v1119_v62 = vpop.f32.mrf.mxu1 }
 0x217   :  { %v822_v1 = vadd.f32 %v1119_v62, %v695_v61 }
 0x218   :  { %v805_v3 = vpop.f32.mrf.mxu1 }
 0x219   :  { %v833_v5 = vadd.f32 %v922_v63, %v822_v1  ;;  %v820_v6 = vadd.f32 %v805_v3, %v687_v0 }
 0x21a   :  { %v1120_v7 = vpop.f32.mrf.mxu1 }
 0x21b   :  { %v845_v9 = vadd.f32 %v929_v18, %v833_v5  ;;  %v831_v10 = vadd.f32 %v922_v63, %v820_v6  ;;  %v823_v11 = vadd.f32 %v1120_v7, %v698_v4 }
 0x21c   :  { %v808_v13 = vpop.f32.mrf.mxu1 }
 0x21d   :  { %v849_v15 = vmax.f32 %v845_v9, 0.0  ;;  %v843_v20 = vadd.f32 %v925_v16, %v831_v10  ;;  %v834_v21 = vadd.f32 %v922_v63, %v823_v11  ;;  %v821_v22 = vadd.f32 %v808_v13, %v690_v8 }
 0x21f   :  { %853 = vst [vmem:[#allocation10 + $0x10] sm:$0xff] %v849_v15  ;;  %v847_v23 = vmax.f32 %v843_v20, 0.0  ;;  %v846_v24 = vadd.f32 %v930_v19, %v834_v21  ;;  %v832_v25 = vadd.f32 %v922_v63, %v821_v22 }
 0x221   :  { %851 = vst [vmem:[#allocation10] sm:$0xff] %v847_v23  ;;  %v850_v26 = vmax.f32 %v846_v24, 0.0  ;;  %v844_v18 = vadd.f32 %v926_v17, %v832_v25 }
 0x223   :  { %854 = vst [vmem:[#allocation10 + $0x18] sm:$0xff] %v850_v26  ;;  %v848_v27 = vmax.f32 %v844_v18, 0.0 }
 0x225   :  { %852 = vst [vmem:[#allocation10 + $0x8] sm:$0xff] %v848_v27 }
 0x226   :  { %1251 = shalt.err (!%p1248_p5)
}
 0x227   :  { %s1273_s12 = smov 128   ;;  %s1274_s13 = smov 8  }
 0x228   :  { %866 = dma.vmem_to_hbm [thread:$0]  %s861_s10, 512, %s1352_s5, [#allocation6], %s1273_s12, %s1273_s12, %s1274_s13  }
 0x229   :  { %1264 = dma.done.wait [#allocation6], 512  }
 0x22a   :  { %1265 = vsyncadd [#allocation6], 4294966784 }
 0x22b   :  { %870 = vsyncpa [#allocation5], 1 }
 0x22c   :  { %871 = vsyncpa [#allocation8], 1 }
 0x22d   :  { %872 = vsyncpa [#allocation6], 1 }

</bundles_post_ra>
